<compile_context>
chip_gen: v5e
topology: v5e:2x2
jax: 0.10.0
libtpu: 0.0.40
codegen_flags: <defaults>
</compile_context>

<pallas_src>
import functools

import jax
import jax.numpy as jnp
from jax.experimental import pallas as pl
from jax.experimental.pallas import tpu as pltpu


LANE = 128  # TPU lane width; pad channel/class dims to multiples of this


# ------------------------- fused Pallas kernel -------------------------

def _fused_kernel(x_ref, wc_ref, bc_ref, wf_ref, bf_ref, o_ref, acc_ref,
                  *, hw_total, tile_hw):
    """Fused 1x1-conv stem + SiLU + global avg-pool + final Linear.

    Grid: (B, num_hw_tiles); batch axis parallel, HW reduction axis last.

    x_ref:  (tile_hw, Cin)      bf16 pixel rows of image b
    wc_ref: (Cin, Cf_pad)       bf16 stem conv weight (zero-padded lanes)
    bc_ref: (1, Cf_pad)         f32 stem conv bias
    wf_ref: (Cf_pad, NC_pad)    f32 final linear weight (transposed, padded)
    bf_ref: (1, NC_pad)         f32 final linear bias
    o_ref:  (1, NC_pad)         f32 logits for image b
    acc_ref:(1, Cf_pad)         f32 VMEM pooled-sum accumulator
    """
    h = pl.program_id(1)

    @pl.when(h == 0)
    def _init():
        acc_ref[...] = jnp.zeros_like(acc_ref)

    # --- stem: 1x1 conv (bf16 MXU, f32 accumulate) + SiLU ---
    y = jnp.dot(x_ref[...], wc_ref[...], preferred_element_type=jnp.float32)
    y = y + bc_ref[...]
    y = y * jax.nn.sigmoid(y)                     # SiLU

    if hw_total % tile_hw:                        # static: mask tail rows past HW
        row = h * tile_hw + jax.lax.broadcasted_iota(jnp.int32, y.shape, 0)
        y = jnp.where(row < hw_total, y, 0.0)

    # --- incremental global pooling: running sum over pixel rows ---
    acc_ref[...] += jnp.sum(y, axis=0, keepdims=True)

    # --- finalize: average + final nn.Linear -> logits (lane-dense store) ---
    @pl.when(h == pl.num_programs(1) - 1)
    def _finalize():
        pooled = acc_ref[...] * (1.0 / hw_total)               # (1, Cf_pad)
        logits = jnp.dot(pooled, wf_ref[...],
                         preferred_element_type=jnp.float32)   # (1, NC_pad)
        o_ref[...] = logits + bf_ref[...]


# ------------------------- wrapper -------------------------

def _pad_axis(a, axis, mult):
    pad = (-a.shape[axis]) % mult
    if pad == 0:
        return a
    widths = [(0, 0)] * a.ndim
    widths[axis] = (0, pad)
    return jnp.pad(a, widths)


def fused_forward(x_nchw, w_conv, b_conv, w_final, b_final, *, tile_hw=2048):
    """x_nchw: (B, Cin, H, W) -> logits (B, n_classes)."""
    B, Cin, H, W = x_nchw.shape
    HW = H * W
    NC = w_final.shape[1]

    # channels-last pixel rows; bf16 activation stream halves HBM read bytes
    x_rows = jnp.transpose(x_nchw, (0, 2, 3, 1)).reshape(B, HW, Cin)
    x_rows = x_rows.astype(jnp.bfloat16)

    # lane-dense (zero-padded to 128) weights / biases
    wc = _pad_axis(w_conv.astype(jnp.bfloat16), 1, LANE)                 # (Cin, Cf_pad)
    bc = _pad_axis(b_conv.astype(jnp.float32), 1, LANE)                  # (1, Cf_pad)
    wf = _pad_axis(_pad_axis(w_final.astype(jnp.float32), 0, LANE), 1, LANE)  # (Cf_pad, NC_pad)
    bf = _pad_axis(b_final.astype(jnp.float32), 1, LANE)                 # (1, NC_pad)
    Cf_pad = wc.shape[1]
    NC_pad = wf.shape[1]

    # sublane-aligned row tile; non-divisible HW handled by masked tail tile
    if HW <= 8:
        tile_hw = HW
    else:
        tile_hw = max(8, min(tile_hw, HW))
        tile_hw -= tile_hw % 8
    n_hw = pl.cdiv(HW, tile_hw)

    kernel = functools.partial(_fused_kernel, hw_total=HW, tile_hw=tile_hw)

    out = pl.pallas_call(
        kernel,
        out_shape=jax.ShapeDtypeStruct((B, 1, NC_pad), jnp.float32),
        grid_spec=pltpu.PrefetchScalarGridSpec(
            num_scalar_prefetch=0,
            grid=(B, n_hw),
            in_specs=[
                pl.BlockSpec((None, tile_hw, Cin), lambda b, h: (b, h, 0)),
                pl.BlockSpec((Cin, Cf_pad), lambda b, h: (0, 0)),
                pl.BlockSpec((1, Cf_pad), lambda b, h: (0, 0)),
                pl.BlockSpec((Cf_pad, NC_pad), lambda b, h: (0, 0)),
                pl.BlockSpec((1, NC_pad), lambda b, h: (0, 0)),
            ],
            out_specs=pl.BlockSpec((None, 1, NC_pad), lambda b, h: (b, 0, 0)),
            scratch_shapes=[pltpu.VMEM((1, Cf_pad), jnp.float32)],
        ),
        compiler_params=pltpu.CompilerParams(
            dimension_semantics=("parallel", "arbitrary"),
            vmem_limit_bytes=32 * 1024 * 1024,
        ),
    )(x_rows, wc, bc, wf, bf)

    return out.reshape(B, NC_pad)[:, :NC]


def model_forward(x_nchw, label, params, *, tile_hw=2048):
    """Mirrors Model.forward(x, label) with use_fc=False, metric='softmax'
    (softmax metric: final head is nn.Linear, label is not consumed)."""
    del label
    return fused_forward(x_nchw, params["w_conv"], params["b_conv"],
                         params["w_final"], params["b_final"],
                         tile_hw=tile_hw)


# ------------------------- parameter init -------------------------

def init_params(key, cin, cfeat, n_classes):
    k1, k2, k3, k4 = jax.random.split(key, 4)
    return {
        # backbone stem stand-in: 1x1 conv, weight stored as (Cin, Cf)
        "w_conv": jax.random.normal(k1, (cin, cfeat), jnp.float32) * 0.1,
        "b_conv": jax.random.normal(k2, (1, cfeat), jnp.float32) * 0.01,
        # final nn.Linear(final_in_features, n_classes), stored transposed (Cf, NC)
        "w_final": jax.random.normal(k3, (cfeat, n_classes), jnp.float32) * 0.1,
        "b_final": jax.random.normal(k4, (1, n_classes), jnp.float32) * 0.01,
    }


# ------------------------- main -------------------------

if __name__ == "__main__":
    B, Cin, H, W = 2, 4, 16, 16
    CFEAT = 32          # stand-in "final_in_features"
    N_CLASSES = 10

    key = jax.random.PRNGKey(0)
    kx, kl, kp = jax.random.split(key, 3)
    x = jax.random.normal(kx, (B, Cin, H, W), jnp.float32)
    label = jax.random.randint(kl, (B,), 0, N_CLASSES)
    params = init_params(kp, Cin, CFEAT, N_CLASSES)

    # pure-JAX f32 reference (kernel streams activations / stem weights in
    # bf16 with f32 accumulation -> slightly loosened tolerance)
    xr = jnp.transpose(x, (0, 2, 3, 1)).reshape(B * H * W, Cin)
    y = xr @ params["w_conv"] + params["b_conv"]
    y = y * jax.nn.sigmoid(y)
    pooled = y.reshape(B, H * W, CFEAT).mean(axis=1)
    ref = pooled @ params["w_final"] + params["b_final"]

    # (a) tile_hw=128 -> 2 reduction steps over HW=256: exercises the VMEM
    #     pooled-sum accumulator (init / accumulate / finalize) path.
    logits = jax.block_until_ready(model_forward(x, label, params, tile_hw=128))
    assert logits.shape == (B, N_CLASSES)
    assert jnp.allclose(logits, ref, atol=1e-2, rtol=1e-2), (
        float(jnp.max(jnp.abs(logits - ref))))

    # (b) default tile (clamps to the full HW=256 rows): single-step path.
    logits1 = jax.block_until_ready(model_forward(x, label, params))
    assert jnp.allclose(logits1, ref, atol=1e-2, rtol=1e-2), (
        float(jnp.max(jnp.abs(logits1 - ref))))

    print("KERNEL_OK")
</pallas_src>

<mosaic_0001>
module attributes {stable_mosaic.version = 11 : i64} {
  func.func @_fused_kernel(%arg0: i32, %arg1: i32, %arg2: memref<1x128x4xbf16, #tpu.memory_space<vmem>>, %arg3: memref<4x128xbf16, #tpu.memory_space<vmem>>, %arg4: memref<1x128xf32, #tpu.memory_space<vmem>>, %arg5: memref<128x128xf32, #tpu.memory_space<vmem>>, %arg6: memref<1x128xf32, #tpu.memory_space<vmem>>, %arg7: memref<1x1x128xf32, #tpu.memory_space<vmem>>, %arg8: memref<1x128xf32, #tpu.memory_space<vmem>>) attributes {dimension_semantics = [#tpu.dimension_semantics<parallel>, #tpu.dimension_semantics<arbitrary>], iteration_bounds = array<i64: 2, 2>, scalar_prefetch = 0 : i64, scratch_operands = 1 : i64, tpu.core_type = #tpu.core_type<tc>, window_params = [{transform_indices = @transform_0, window_bounds = array<i64: 1, 128, 4>}, {pipeline_mode = #tpu.pipeline_mode<synchronous>, transform_indices = @transform_1, window_bounds = array<i64: 4, 128>}, {pipeline_mode = #tpu.pipeline_mode<synchronous>, transform_indices = @transform_2, window_bounds = array<i64: 1, 128>}, {pipeline_mode = #tpu.pipeline_mode<synchronous>, transform_indices = @transform_3, window_bounds = array<i64: 128, 128>}, {pipeline_mode = #tpu.pipeline_mode<synchronous>, transform_indices = @transform_4, window_bounds = array<i64: 1, 128>}, {transform_indices = @transform_5, window_bounds = array<i64: 1, 1, 128>}]} {
    %c0_i32 = arith.constant 0 : i32
    %0 = arith.cmpi eq, %arg1, %c0_i32 : i32
    %1 = arith.extui %0 : i1 to i32
    %c0_i32_0 = arith.constant 0 : i32
    %2 = arith.cmpi ne, %1, %c0_i32_0 : i32
    scf.if %2 {
      %cst_14 = arith.constant 0.000000e+00 : f32
      %24 = vector.broadcast %cst_14 : f32 to vector<1x128xf32>
      %c0_15 = arith.constant 0 : index
      %c0_16 = arith.constant 0 : index
      %25 = vector.load %arg8[%c0_15, %c0_16] : memref<1x128xf32, #tpu.memory_space<vmem>>, vector<1x128xf32>
      tpu.vector_store %arg8[%c0_15, %c0_16], %24 {strides = array<i32>} : memref<1x128xf32, #tpu.memory_space<vmem>>, vector<1x128xf32>,
    } else {
    }
    %c0 = arith.constant 0 : index
    %c0_1 = arith.constant 0 : index
    %c0_2 = arith.constant 0 : index
    %3 = vector.load %arg2[%c0, %c0_1, %c0_2] : memref<1x128x4xbf16, #tpu.memory_space<vmem>>, vector<1x128x4xbf16>
    %4 = vector.shape_cast %3 : vector<1x128x4xbf16> to vector<128x4xbf16>
    %c0_3 = arith.constant 0 : index
    %c0_4 = arith.constant 0 : index
    %5 = vector.load %arg3[%c0_3, %c0_4] : memref<4x128xbf16, #tpu.memory_space<vmem>>, vector<4x128xbf16>
    %cst = arith.constant dense<0.000000e+00> : vector<128x128xf32>
    %6 = tpu.matmul %4, %5, %cst {dimension_numbers = #tpu.dot_dimension_numbers<[1], [0], [0], [1], [0, 0, 1, 1], [], []>} : vector<128x4xbf16>, vector<4x128xbf16>, vector<128x128xf32> -> vector<128x128xf32>
    %c0_5 = arith.constant 0 : index
    %c0_6 = arith.constant 0 : index
    %7 = vector.load %arg4[%c0_5, %c0_6] : memref<1x128xf32, #tpu.memory_space<vmem>>, vector<1x128xf32>
    %8 = vector.broadcast %7 : vector<1x128xf32> to vector<128x128xf32>
    %9 = arith.addf %6, %8 : vector<128x128xf32>
    %10 = arith.negf %9 : vector<128x128xf32>
    %11 = math.exp %10 : vector<128x128xf32>
    %cst_7 = arith.constant 1.000000e+00 : f32
    %12 = vector.broadcast %cst_7 : f32 to vector<128x128xf32>
    %13 = arith.addf %12, %11 : vector<128x128xf32>
    %14 = arith.divf %12, %13 : vector<128x128xf32>
    %15 = arith.mulf %9, %14 : vector<128x128xf32>
    %c0_8 = arith.constant 0 : index
    %c0_9 = arith.constant 0 : index
    %16 = vector.load %arg8[%c0_8, %c0_9] : memref<1x128xf32, #tpu.memory_space<vmem>>, vector<1x128xf32>
    %cst_10 = arith.constant dense<0.000000e+00> : vector<128xf32>
    %17 = vector.multi_reduction <add>, %15, %cst_10 [0] : vector<128x128xf32> to vector<128xf32>
    %18 = vector.shape_cast %17 : vector<128xf32> to vector<1x128xf32>
    %19 = arith.addf %16, %18 : vector<1x128xf32>
    %c0_11 = arith.constant 0 : index
    %c0_12 = arith.constant 0 : index
    %20 = vector.load %arg8[%c0_11, %c0_12] : memref<1x128xf32, #tpu.memory_space<vmem>>, vector<1x128xf32>
    tpu.vector_store %arg8[%c0_11, %c0_12], %19 {strides = array<i32>} : memref<1x128xf32, #tpu.memory_space<vmem>>, vector<1x128xf32>,
    %c1_i32 = arith.constant 1 : i32
    %21 = arith.cmpi eq, %arg1, %c1_i32 : i32
    %22 = arith.extui %21 : i1 to i32
    %c0_i32_13 = arith.constant 0 : i32
    %23 = arith.cmpi ne, %22, %c0_i32_13 : i32
    scf.if %23 {
      %c0_14 = arith.constant 0 : index
      %c0_15 = arith.constant 0 : index
      %24 = vector.load %arg8[%c0_14, %c0_15] : memref<1x128xf32, #tpu.memory_space<vmem>>, vector<1x128xf32>
      %cst_16 = arith.constant 3.906250e-03 : f32
      %25 = vector.broadcast %cst_16 : f32 to vector<1x128xf32>
      %26 = arith.mulf %24, %25 : vector<1x128xf32>
      %c0_17 = arith.constant 0 : index
      %c0_18 = arith.constant 0 : index
      %27 = vector.load %arg5[%c0_17, %c0_18] : memref<128x128xf32, #tpu.memory_space<vmem>>, vector<128x128xf32>
      %cst_19 = arith.constant dense<0.000000e+00> : vector<1x128xf32>
      %28 = tpu.matmul %26, %27, %cst_19 {dimension_numbers = #tpu.dot_dimension_numbers<[1], [0], [0], [1], [0, 0, 1, 1], [], []>} : vector<1x128xf32>, vector<128x128xf32>, vector<1x128xf32> -> vector<1x128xf32>
      %c0_20 = arith.constant 0 : index
      %c0_21 = arith.constant 0 : index
      %29 = vector.load %arg6[%c0_20, %c0_21] : memref<1x128xf32, #tpu.memory_space<vmem>>, vector<1x128xf32>
      %30 = arith.addf %28, %29 : vector<1x128xf32>
      %c0_22 = arith.constant 0 : index
      %c0_23 = arith.constant 0 : index
      %c0_24 = arith.constant 0 : index
      %31 = vector.load %arg7[%c0_22, %c0_23, %c0_24] : memref<1x1x128xf32, #tpu.memory_space<vmem>>, vector<1x1x128xf32>
      %32 = vector.shape_cast %31 : vector<1x1x128xf32> to vector<1x128xf32>
      %33 = vector.shape_cast %30 : vector<1x128xf32> to vector<1x1x128xf32>
      tpu.vector_store %arg7[%c0_22, %c0_23, %c0_24], %33 {strides = array<i32>} : memref<1x1x128xf32, #tpu.memory_space<vmem>>, vector<1x1x128xf32>,
    } else {
    }
    return
  }
  func.func @transform_0(%arg0: i32, %arg1: i32) -> (i32, i32, i32) {
    %c0_i32 = arith.constant 0 : i32
    %c0_i32_0 = arith.constant 0 : i32
    return %arg0, %arg1, %c0_i32 : i32, i32, i32
  }
  func.func @transform_1(%arg0: i32, %arg1: i32) -> (i32, i32) {
    %c0_i32 = arith.constant 0 : i32
    %c0_i32_0 = arith.constant 0 : i32
    %c0_i32_1 = arith.constant 0 : i32
    return %c0_i32, %c0_i32_0 : i32, i32
  }
  func.func @transform_2(%arg0: i32, %arg1: i32) -> (i32, i32) {
    %c0_i32 = arith.constant 0 : i32
    %c0_i32_0 = arith.constant 0 : i32
    %c0_i32_1 = arith.constant 0 : i32
    return %c0_i32, %c0_i32_0 : i32, i32
  }
  func.func @transform_3(%arg0: i32, %arg1: i32) -> (i32, i32) {
    %c0_i32 = arith.constant 0 : i32
    %c0_i32_0 = arith.constant 0 : i32
    %c0_i32_1 = arith.constant 0 : i32
    return %c0_i32, %c0_i32_0 : i32, i32
  }
  func.func @transform_4(%arg0: i32, %arg1: i32) -> (i32, i32) {
    %c0_i32 = arith.constant 0 : i32
    %c0_i32_0 = arith.constant 0 : i32
    %c0_i32_1 = arith.constant 0 : i32
    return %c0_i32, %c0_i32_0 : i32, i32
  }
  func.func @transform_5(%arg0: i32, %arg1: i32) -> (i32, i32, i32) {
    %c0_i32 = arith.constant 0 : i32
    %c0_i32_0 = arith.constant 0 : i32
    %c0_i32_1 = arith.constant 0 : i32
    return %arg0, %c0_i32, %c0_i32_0 : i32, i32, i32
  }
}

</mosaic_0001>

<bundles_post_ra>
// kernel: tpu_custom_call.1
= control target key start
LH: loop header
LB: loop body
LE: loop exit
PB: predicated region body
PF: predicated region fallthrough
CT: control target
= control target key end

     0   :  { %10 = vsyncpa [#allocation4], 0  ;;  %s1916_s0 = inlined_call_operand.vmem [shape: bf16[2,256,4], index: 0, kind: input, shape index: {}]   ;;  %s1917_s1 = inlined_call_operand.vmem [shape: bf16[4,128], index: 1, kind: input, shape index: {}]   ;;  %s1918_s2 = inlined_call_operand.vmem [shape: f32[1,128], index: 2, kind: input, shape index: {}]   ;;  %s1919_s3 = inlined_call_operand.vmem [shape: f32[128,128], index: 3, kind: input, shape index: {}]   ;;  %s1920_s4 = inlined_call_operand.vmem [shape: f32[1,128], index: 4, kind: input, shape index: {}]   ;;  %s1921_s5 = inlined_call_operand.hbm [shape: f32[2,1,128], index: 5, kind: output, shape index: {}]  }
   0x1   :  { %12 = vsyncpa [#allocation4 + $0x1], 0  ;;  %s1211_s18 = smov 0   ;;  %s1213_s19 = smov 0  }
   0x2   :  { %s1215_s20 = smov 0   ;;  %s1217_s21 = smov 0  }
   0x3   :  { %s1219_s22 = smov 0   ;;  %s1221_s23 = smov 0  }
   0x4   :  { %s1223_s24 = smov 0   ;;  %s1225_s25 = smov 0  }
   0x5 LB: > { %s868_s26 = sadd.s32 4294967295, %s1178_s25   ;;  %s869_s27 = sadd.s32 4294967294, %s1178_s25   ;;  %s1178_s25 = sphi %s1225_s25, %s18_s25   ;;  %s1174_s24 = sphi %s1223_s24, %s1974_s24   ;;  %s1170_s23 = sphi %s1221_s23, %s1973_s23   ;;  %s1166_s22 = sphi %s1219_s22, %s1972_s22   ;;  %s1162_s21 = sphi %s1217_s21, %s1971_s21   ;;  %s1158_s20 = sphi %s1215_s20, %s1970_s20   ;;  %s1154_s19 = sphi %s1213_s19, %s1969_s19   ;;  %s1150_s18 = sphi %s1211_s18, %s1968_s18  }
   0x6   : > { %s27_s28 = sadd.s32 1, %s1170_s23  ;;  %s30_s29 = sadd.s32 1, %s1174_s24 }
   0x7   : > { %p28_p0 = scmp.ge.s32.totalorder %s27_s28, 2  ;;  %p159_p1 = scmp.ne.s32.totalorder %s1158_s20, %s1154_s19 }
   0x8   : > { %p160_p2 = scmp.eq.s32.totalorder %s868_s26, 3  ;;  %p165_p4 = scmp.ne.s32.totalorder %s1154_s19, %s1150_s18 }
   0x9   : > { %s1976_s28 = smov (%p28_p0, %s27_s28), 0  ;;  %s1978_s29 = smov (!%p28_p0, %s30_s29), %s1174_s24 }
   0xa   : > { %p1260_p3 = por %p160_p2, %p159_p1  ;;  %p32_p5 = scmp.ge.s32.totalorder %s1978_s29, 2 }
   0xb   : > { %p166_p6 = scmp.eq.s32.totalorder %s869_s27, 3  ;;  %p872_p7 = scmp.ge.s32.totalorder %s1178_s25, 1 }
   0xc   : > { %p209_p8 = scmp.lt.s32.totalorder %s1178_s25, 5  ;;  %s1980_s29 = smov (%p32_p5, %s1978_s29), 0 }
   0xd   : > { %p1270_p9 = por %p166_p6, %p165_p4  ;;  %s146_s7 = ssub.s32 %s1174_s24, %s1980_s29 }
   0xe   : > { %p210_p10 = pnand %p872_p7, %p209_p8  ;;  %s149_s8 = sadd.s32 1, %s1158_s20 }
   0xf   : > { %p147_p11 = scmp.eq.s32.totalorder %s146_s7, 0  ;;  %s238_s10 = sand.u32 (!%p210_p10), 1, %s1154_s19  }
  0x10   : > { %213 = sbr.rel (%p210_p10) target bundleno = 443 (0x1bb), region = 40  ;;  %s873_s11 = sshll.u32 (!%p210_p10), %s1162_s21, 4 }
  0x11   : > { %s1278_s9 = scalar_select %p147_p11, %s1158_s20, %s149_s8  }
  0x12   : > { %p241_p12 = scmp.lt.s32.totalorder (!%p210_p10), %s1166_s22, 1  ;;  %p243_p13 = scmp.lt.s32.totalorder (!%p210_p10), %s873_s11, 31 }
  0x13   : > { %s1289_s27 = scalar_lea.vmem (!%p210_p10), [#allocation3], %s238_s10  ;;  %p876_p0 = scmp.ne.s32.totalorder (!%p210_p10), %s1162_s21, 0 }
  0x15   : > { %s242_s12 = scalar_select %p241_p12, %s1166_s22, 1 }
  0x16   : > { %s1982_s11 = smov (!%p243_p13, %s873_s11), 31  ;;  %254 = sbr.rel (%p876_p0) target bundleno = 29 (0x1d), region = 44 }
  0x17   : > { %s874_s13 = sshll.u32 %s242_s12, 5 }
  0x18   : > { %s246_s14 = sadd.s32 %s874_s13, %s1982_s11 }
  0x19   : > { %s875_s15 = sshll.u32 %s246_s14, 2 }
  0x1a   : > { %s248_s26 = scalar_lea.vmem %s1916_s0, %s875_s15 }
  0x1b   : > { %v1180_v0 = vmov 0.0  }
  0x1c   : > { %255 = vst [vmem:[#allocation2] sm:$0x1] %v1180_v0 }
  0x1d PF: > { %v272_v1 = vld [vmem:[%s1917_s1] sm:$0x3]  ;;  %vm342_vm0 = vcmask 1041408   ;;  %v938_v4 = vld [vmem:[%s248_s26 + $0x10] sm:$0xff]  ;;  %vm317_vm1 = vcmask 31744   ;;  %v937_v7 = vld [vmem:[%s248_s26 + $0x8] sm:$0xff] }
  0x1e   : > { %v344_v2 = vsel %vm342_vm0, %v272_v1, 0  ;;  %v936_v3 = vld [vmem:[%s248_s26] sm:$0xff]  ;;  %v942_v6 = vld [vmem:[%s248_s26 + $0x30] sm:$0xff]  ;;  %v939_v8 = vld [vmem:[%s248_s26 + $0x18] sm:$0xff]  ;;  %p933_p1 = scmp.ne.s32.totalorder %s1162_s21, 1 }
  0x1f   : > { %353 = vmatpush.bf16.msra.mxu0 %v344_v2  ;;  %944 = vmatpush.bf16.msra.mxu1 %v344_v2  ;;  %v940_v5 = vld [vmem:[%s248_s26 + $0x20] sm:$0xff]  ;;  %v941_v9 = vld [vmem:[%s248_s26 + $0x28] sm:$0xff]  ;;  %v943_v10 = vld [vmem:[%s248_s26 + $0x38] sm:$0xff] }
  0x20   : > { %945 = vmatpush.bf16.msra.mxu2 %v344_v2  ;;  %946 = vmatpush.bf16.msra.mxu3 %v344_v2  ;;  %v1306_v11 = vld [vmem:[%s1918_s2] ss:$0 sm:$0xff] }
  0x22   : > { %909 = vmatmul.msk.bf16.vlgmr.msra.gmra.mxu0 %vm317_vm1, %v936_v3  ;;  %911 = vmatmul.msk.bf16.vlgmr.msra.gmra.mxu1 %vm317_vm1, %v938_v4 }
  0x23   : > { %913 = vmatmul.msk.bf16.vlgmr.msra.gmra.mxu2 %vm317_vm1, %v940_v5  ;;  %915 = vmatmul.msk.bf16.vlgmr.msra.gmra.mxu3 %vm317_vm1, %v942_v6 }
  0x32   : > { %910 = vmatmul.msk.bf16.gmra.mxu0 %vm317_vm1, %v937_v7  ;;  %912 = vmatmul.msk.bf16.gmra.mxu1 %vm317_vm1, %v939_v8 }
  0x33   : > { %914 = vmatmul.msk.bf16.gmra.mxu2 %vm317_vm1, %v941_v9  ;;  %916 = vmatmul.msk.bf16.gmra.mxu3 %vm317_vm1, %v943_v10 }
  0x9f   : > { %v355_v12 = vpop.f32.mrf.mxu0  ;;  %v365_v14 = vpop.f32.mrf.mxu1 }
  0xa0   : > { %v1309_v13 = vadd.f32 %v1306_v11, %v355_v12  ;;  %v1313_v16 = vadd.f32 %v1306_v11, %v365_v14 }
  0xa2   : > { %v917_v15 = vmul.f32 -1.442695, %v1309_v13  ;;  %v921_v19 = vmul.f32 -1.442695, %v1313_v16 }
  0xa4   : > { %1020 = vpow2.f32 %v917_v15 }
  0xa5   : > { %1022 = vpow2.f32 %v921_v19 }
  0xa6   : > { %v375_v18 = vpop.f32.mrf.mxu2  ;;  %v385_v24 = vpop.f32.mrf.mxu3 }
  0xa7   : > { %v357_v17 = vpop.f32.mrf.mxu0  ;;  %v367_v21 = vpop.f32.mrf.mxu1  ;;  %v1320_v22 = vadd.f32 %v1306_v11, %v375_v18  ;;  %v1330_v29 = vadd.f32 %v1306_v11, %v385_v24 }
  0xa8   : > { %v1317_v20 = vadd.f32 %v1306_v11, %v357_v17  ;;  %v1323_v25 = vadd.f32 %v1306_v11, %v367_v21 }
  0xa9   : > { %v925_v27 = vmul.f32 -1.442695, %v1320_v22  ;;  %v929_v33 = vmul.f32 -1.442695, %v1330_v29 }
  0xaa   : > { %v1021_v23 = vpop.eup %1020  ;;  %v918_v26 = vmul.f32 -1.442695, %v1317_v20  ;;  %v922_v30 = vmul.f32 -1.442695, %v1323_v25 }
  0xab   : > { %v1327_v28 = vadd.f32 1.0, %v1021_v23  ;;  %v1023_v31 = vpop.eup %1022 }
  0xac   : > { %1024 = vpow2.f32 %v918_v26  ;;  %v1335_v34 = vadd.f32 1.0, %v1023_v31 }
  0xad   : > { %1026 = vpow2.f32 %v925_v27  ;;  %v468_v59 = vand.u32 2147483647, %v1327_v28  ;;  %v470_v60 = vand.u32 2147483648, %v1327_v28  ;;  %vm464_vm2 = vweird.f32 %v1327_v28 }
  0xae   : > { %1028 = vrcp.f32 %v1327_v28  ;;  %v377_v36 = vpop.f32.mrf.mxu2  ;;  %v387_v46 = vpop.f32.mrf.mxu3  ;;  %v530_v1 = vand.u32 2147483648, %v1335_v34  ;;  %vm524_vm3 = vweird.f32 %v1335_v34  ;;  %v528_v4 = vand.u32 2147483647, %v1335_v34 }
  0xaf   : > { %v360_v32 = vpop.f32.mrf.mxu0  ;;  %1030 = vpow2.f32 %v922_v30  ;;  %v370_v43 = vpop.f32.mrf.mxu1  ;;  %v1349_v45 = vadd.f32 %v1306_v11, %v377_v36  ;;  %v1376_v63 = vadd.f32 %v1306_v11, %v387_v46  ;;  %vm1389_vm4 = vcmp.eq.f32.partialorder %v468_v59, 8.507059e+37 }
  0xb0   : > { %v1338_v35 = vadd.f32 %v1306_v11, %v360_v32  ;;  %1032 = vpow2.f32 %v929_v33  ;;  %v1356_v50 = vadd.f32 %v1306_v11, %v370_v43  ;;  %v471_v9 = vor.u32 1.1754944e-38, %v470_v60 }
  0xb1   : > { %1034 = vrcp.f32 %v1335_v34  ;;  %v926_v52 = vmul.f32 -1.442695, %v1349_v45  ;;  %v930_v18 = vmul.f32 -1.442695, %v1376_v63  ;;  %v1405_v23 = vor.u32 1.1754944e-38, %v530_v1 }
  0xb2   : > { %v1025_v37 = vpop.eup %1024  ;;  %v919_v40 = vmul.f32 -1.442695, %v1338_v35  ;;  %v923_v56 = vmul.f32 -1.442695, %v1356_v50  ;;  %vm1435_vm8 = vcmp.eq.f32.partialorder %v528_v4, 8.507059e+37 }
  0xb3   : > { %v1027_v38 = vpop.eup %1026  ;;  %v1344_v42 = vadd.f32 1.0, %v1025_v37 }
  0xb4   : > { %v1340_v39 = vpop.eup %1028  ;;  %v1346_v44 = vadd.f32 1.0, %v1027_v38  ;;  %1036 = vpow2.f32 %v919_v40 }
  0xb5   : > { %v1031_v41 = vpop.eup %1030  ;;  %v460_v47 = vmul.f32 %v1340_v39, %v1327_v28  ;;  %1038 = vrcp.f32 %v1344_v42  ;;  %vm465_vm5 = vweird.f32 %v1340_v39  ;;  %vm479_vm10 = vweird.f32 %v1344_v42 }
  0xb6   : > { %v1033_v48 = vpop.eup %1032  ;;  %v1353_v49 = vadd.f32 1.0, %v1031_v41  ;;  %1040 = vrcp.f32 %v1346_v44  ;;  %v380_v55 = vpop.f32.mrf.mxu2  ;;  %v590_v5 = vand.u32 2147483648, %v1346_v44  ;;  %v588_v24 = vand.u32 2147483647, %v1346_v44  ;;  %vm1421_vm7 = vmor %vm464_vm2, %vm465_vm5 }
  0xb7   : > { %v1359_v51 = vpop.eup %1034  ;;  %v461_v53 = vsub.f32 1.0, %v460_v47  ;;  %v1363_v54 = vadd.f32 1.0, %v1033_v48  ;;  %v390_v2 = vpop.f32.mrf.mxu3  ;;  %v1397_v14 = vadd.f32 %v1306_v11, %v380_v55  ;;  %vm584_vm9 = vweird.f32 %v1346_v44 }
  0xb8   : > { %1042 = vrcp.f32 %v1353_v49  ;;  %v520_v57 = vmul.f32 %v1359_v51, %v1335_v34  ;;  %v362_v19 = vpop.f32.mrf.mxu0  ;;  %vm525_vm6 = vweird.f32 %v1359_v51  ;;  %v1412_v31 = vor.u32 1.1754944e-38, %v590_v5  ;;  %v372_v33 = vpop.f32.mrf.mxu1 }
  0xb9   : > { %1044 = vpow2.f32 %v926_v52  ;;  %v462_v62 = vmul.f32 %v1340_v39, %v461_v53  ;;  %v650_v10 = vand.u32 2147483648, %v1363_v54  ;;  %v648_v26 = vand.u32 2147483647, %v1363_v54  ;;  %vm1471_vm13 = vmor %vm524_vm3, %vm525_vm6 }
  0xba   : > { %v1037_v58 = vpop.eup %1036  ;;  %1046 = vrcp.f32 %v1363_v54  ;;  %v521_v3 = vsub.f32 1.0, %v520_v57  ;;  %v927_v43 = vmul.f32 -1.442695, %v1397_v14  ;;  %v1429_v46 = vadd.f32 %v1306_v11, %v362_v19 }
  0xbb   : > { %v1371_v61 = vpop.eup %1038  ;;  %1048 = vpow2.f32 %v923_v56  ;;  %v1385_v6 = vadd.f32 1.0, %v1037_v58  ;;  %v463_v15 = vadd.f32 %v1340_v39, %v462_v62  ;;  %v1425_v40 = vor.u32 1.1754944e-38, %v650_v10 }
  0xbc   : > { %v1378_v0 = vpop.eup %1040  ;;  %v475_v12 = vmul.f32 %v1371_v61, %v1344_v42  ;;  %v522_v30 = vmul.f32 %v1359_v51, %v521_v3  ;;  %v483_v52 = vand.u32 2147483647, %v1344_v42  ;;  %v1445_v56 = vadd.f32 %v1306_v11, %v372_v33 }
  0xbd   : > { %v580_v17 = vmul.f32 %v1378_v0, %v1346_v44  ;;  %1050 = vrcp.f32 %v1385_v6  ;;  %v467_v47 = vsel %vm1421_vm7, %v1340_v39, %v463_v15  ;;  %vm585_vm11 = vweird.f32 %v1378_v0 }
  0xbe   : > { %v1387_v7 = vpop.eup %1042  ;;  %v382_v36 = vpop.f32.mrf.mxu2  ;;  %v476_v41 = vsub.f32 1.0, %v475_v12  ;;  %1052 = vpow2.f32 %v930_v18  ;;  %v523_v57 = vadd.f32 %v1359_v51, %v522_v30  ;;  %v920_v62 = vmul.f32 -1.442695, %v1429_v46  ;;  %vm1539_vm6 = vmor %vm584_vm9, %vm585_vm11 }
  0xbf   : > { %v1045_v21 = vpop.eup %1044  ;;  %v535_v32 = vmul.f32 %v1387_v7, %v1353_v49  ;;  %v581_v48 = vsub.f32 1.0, %v580_v17  ;;  %v1448_v39 = vadd.f32 %v1306_v11, %v382_v36  ;;  %1054 = vpow2.f32 %v927_v43  ;;  %v392_v1 = vpop.f32.mrf.mxu3 }
  0xc0   : > { %v1409_v27 = vpop.eup %1046  ;;  %v1442_v55 = vadd.f32 1.0, %v1045_v21  ;;  %v477_v60 = vmul.f32 %v1371_v61, %v476_v41  ;;  %v472_v4 = vsel %vm1389_vm4, %v471_v9, %v467_v47  ;;  %vm644_vm12 = vweird.f32 %v1363_v54 }
  0xc1   : > { %v1049_v37 = vpop.eup %1048  ;;  %v640_v53 = vmul.f32 %v1409_v27, %v1363_v54  ;;  %v536_v58 = vsub.f32 1.0, %v535_v32  ;;  %v582_v5 = vmul.f32 %v1378_v0, %v581_v48  ;;  %v485_v10 = vand.u32 2147483648, %v1344_v42 }
  0xc2   : > { %v1452_v59 = vadd.f32 1.0, %v1049_v37  ;;  %v1465_v12 = vadd.f32 %v1306_v11, %v390_v2  ;;  %vm1475_vm14 = vcmp.eq.f32.partialorder %v483_v52, 8.507059e+37  ;;  %1056 = vrcp.f32 %v1442_v55 }
  0xc3   : > { %v1457_v3 = vpop.eup %1050  ;;  %v641_v17 = vsub.f32 1.0, %v640_v53  ;;  %v924_v9 = vmul.f32 -1.442695, %v1445_v56  ;;  %v928_v2 = vmul.f32 -1.442695, %v1448_v39  ;;  %v527_v34 = vsel %vm1471_vm13, %v1359_v51, %v523_v57 }
  0xc4   : > { %v1053_v18 = vpop.eup %1052  ;;  %v537_v19 = vmul.f32 %v1387_v7, %v536_v58  ;;  %1058 = vrcp.f32 %v1452_v59  ;;  %v1488_v21 = vadd.f32 %v1306_v11, %v392_v1  ;;  %v478_v30 = vadd.f32 %v1371_v61, %v477_v60 }
  0xc5   : > { %vm480_vm15 = vweird.f32 %v1371_v61  ;;  %v490_v32 = vmul.f32 %v1457_v3, %v1385_v6  ;;  %1060 = vpow2.f32 %v920_v62  ;;  %v1495_v33 = vmul.f32 %v472_v4, %v1309_v13  ;;  %v1055_v36 = vpop.eup %1054 }
  0xc6   : > { %vm1497_vm0 = vcmp.eq.f32.partialorder %v588_v24, 8.507059e+37  ;;  %vm539_vm1 = vweird.f32 %v1353_v49  ;;  %v931_v11 = vmul.f32 -1.442695, %v1465_v12  ;;  %1062 = vpow2.f32 %v924_v9  ;;  %vm1520_vm3 = vmor %vm479_vm10, %vm480_vm15 }
  0xc7   : > { %v583_v37 = vadd.f32 %v1378_v0, %v582_v5  ;;  %v642_v38 = vmul.f32 %v1409_v27, %v641_v17  ;;  %v1505_v41 = vadd.f32 1.0, %v1053_v18  ;;  %1064 = vpow2.f32 %v928_v2 }
  0xc8   : > { %v532_v13 = vsel %vm1435_vm8, %v1405_v23, %v527_v34  ;;  %vm1512_vm2 = vcmp.eq.f32.partialorder %v648_v26, 8.507059e+37  ;;  %v538_v47 = vadd.f32 %v1387_v7, %v537_v19  ;;  %vm540_vm4 = vweird.f32 %v1387_v7  ;;  %v1527_v48 = vpop.eup %1056 }
  0xc9   : > { %v932_v23 = vmul.f32 -1.442695, %v1488_v21  ;;  %vm645_vm5 = vweird.f32 %v1409_v27  ;;  %v482_v26 = vsel %vm1520_vm3, %v1371_v61, %v478_v30  ;;  %v486_v52 = vor.u32 1.1754944e-38, %v485_v10  ;;  %vm1558_vm7 = vmor %vm539_vm1, %vm540_vm4 }
  0xca   : > { %v491_v42 = vsub.f32 1.0, %v490_v32  ;;  %v1533_v28 = vpop.eup %1058  ;;  %v543_v57 = vand.u32 2147483647, %v1353_v49  ;;  %v545_v58 = vand.u32 2147483648, %v1353_v49  ;;  %v1545_v60 = vadd.f32 1.0, %v1055_v36  ;;  %vm1574_vm8 = vmor %vm644_vm12, %vm645_vm5 }
  0xcb   : > { %1066 = vpow2.f32 %v931_v11  ;;  %v1061_v61 = vpop.eup %1060  ;;  %v1548_v62 = vmul.f32 %v532_v13, %v1313_v16  ;;  %v587_v1 = vsel %vm1539_vm6, %v1378_v0, %v583_v37  ;;  %v643_v44 = vadd.f32 %v1409_v27, %v642_v38 }
  0xcc   : > { %1068 = vrcp.f32 %v1505_v41  ;;  %v1063_v5 = vpop.eup %1062  ;;  %v487_v16 = vsel %vm1475_vm14, %v486_v52, %v482_v26  ;;  %v542_v0 = vsel %vm1558_vm7, %v1387_v7, %v538_v47  ;;  %v595_v10 = vmul.f32 %v1527_v48, %v1442_v55 }
  0xcd   : > { %1070 = vpow2.f32 %v932_v23  ;;  %v1065_v15 = vpop.eup %1064  ;;  %v492_v17 = vmul.f32 %v1457_v3, %v491_v42  ;;  %v550_v8 = vmul.f32 %v1533_v28, %v1452_v59  ;;  %v1581_v9 = vadd.f32 1.0, %v1061_v61 }
  0xce   : > { %v1583_v7 = vadd.f32 1.0, %v1063_v5  ;;  %vm544_vm9 = vcmp.eq.f32.partialorder %v543_v57, 8.507059e+37  ;;  %v546_v2 = vor.u32 1.1754944e-38, %v545_v58  ;;  %1072 = vrcp.f32 %v1545_v60 }
  0xcf   : > { %v1586_v18 = vadd.f32 1.0, %v1065_v15  ;;  %v592_v54 = vsel %vm1497_vm0, %v1412_v31, %v587_v1  ;;  %v603_v34 = vand.u32 2147483647, %v1442_v55  ;;  %v605_v19 = vand.u32 2147483648, %v1442_v55 }
  0xd0   : > { %1074 = vrcp.f32 %v1581_v9  ;;  %v647_v32 = vsel %vm1574_vm8, %v1409_v27, %v643_v44  ;;  %v700_v11 = vmul.f32 %v487_v16, %v1317_v20  ;;  %v547_v36 = vsel %vm544_vm9, %v546_v2, %v542_v0 }
  0xd1   : > { %v1067_v30 = vpop.eup %1066  ;;  %v596_v37 = vsub.f32 1.0, %v595_v10  ;;  %v493_v51 = vadd.f32 %v1457_v3, %v492_v17  ;;  %vm495_vm10 = vweird.f32 %v1457_v3  ;;  %v551_v31 = vsub.f32 1.0, %v550_v8 }
  0xd2   : > { %v1598_v38 = vpop.eup %1068  ;;  %1076 = vrcp.f32 %v1583_v7  ;;  %v1604_v43 = vmul.f32 %v592_v54, %v1320_v22  ;;  %v498_v47 = vand.u32 2147483647, %v1385_v6  ;;  %v500_v27 = vand.u32 2147483648, %v1385_v6 }
  0xd3   : > { %v1071_v13 = vpop.eup %1070  ;;  %1078 = vrcp.f32 %v1586_v18  ;;  %v1612_v20 = vsel %vm1512_vm2, %v1425_v40, %v647_v32  ;;  %v1614_v23 = vor.u32 1.1754944e-38, %v605_v19  ;;  %vm494_vm11 = vweird.f32 %v1385_v6 }
  0xd4   : > { %v1617_v26 = vadd.f32 1.0, %v1067_v30  ;;  %v1619_v52 = vpop.eup %1072  ;;  %v716_v22 = vadd.f32 %v700_v11, %v1495_v33  ;;  %v1623_v42 = vmul.f32 %v547_v36, %v1323_v25  ;;  %v597_v53 = vmul.f32 %v1527_v48, %v596_v37  ;;  %vm1629_vm12 = vmor %vm494_vm11, %vm495_vm10 }
  0xd5   : > { %v663_v57 = vand.u32 2147483647, %v1505_v41  ;;  %vm600_vm13 = vweird.f32 %v1527_v48  ;;  %v1636_v24 = vmul.f32 %v1598_v38, %v1505_v41  ;;  %v497_v25 = vsel %vm1629_vm12, %v1457_v3, %v493_v51 }
  0xd6   : > { %v1075_v6 = vpop.eup %1074  ;;  %v552_v33 = vmul.f32 %v1533_v28, %v551_v31  ;;  %v1642_v58 = vadd.f32 1.0, %v1071_v13  ;;  %vm499_vm14 = vcmp.eq.f32.partialorder %v498_v47, 8.507059e+37  ;;  %v501_v61 = vor.u32 1.1754944e-38, %v500_v27 }
  0xd7   : > { %vm554_vm15 = vweird.f32 %v1452_v59  ;;  %v505_v1 = vmul.f32 %v1075_v6, %v1581_v9  ;;  %vm599_vm0 = vweird.f32 %v1442_v55  ;;  %v558_v4 = vand.u32 2147483647, %v1452_v59 }
  0xd8   : > { %v1646_v44 = vpop.eup %1076  ;;  %v560_v5 = vand.u32 2147483648, %v1452_v59  ;;  %v610_v3 = vmul.f32 %v1619_v52, %v1545_v60  ;;  %1080 = vrcp.f32 %v1617_v26  ;;  %v502_v0 = vsel %vm499_vm14, %v501_v61, %v497_v25  ;;  %vm1702_vm10 = vmor %vm599_vm0, %vm600_vm13 }
  0xd9   : > { %v1654_v16 = vpop.eup %1078  ;;  %vm555_vm1 = vweird.f32 %v1533_v28  ;;  %v506_v10 = vsub.f32 1.0, %v505_v1  ;;  %v565_v15 = vmul.f32 %v1646_v44, %v1583_v7  ;;  %v553_v49 = vadd.f32 %v1533_v28, %v552_v33 }
  0xda   : > { %v513_v17 = vand.u32 2147483647, %v1581_v9  ;;  %v515_v8 = vand.u32 2147483648, %v1581_v9  ;;  %1082 = vrcp.f32 %v1642_v58  ;;  %vm510_vm2 = vweird.f32 %v1075_v6  ;;  %vm1676_vm4 = vmor %vm554_vm15, %vm555_vm1 }
  0xdb   : > { %v507_v2 = vmul.f32 %v1075_v6, %v506_v10  ;;  %v566_v54 = vsub.f32 1.0, %v565_v15  ;;  %v625_v19 = vmul.f32 %v1654_v16, %v1586_v18  ;;  %v598_v30 = vadd.f32 %v1527_v48, %v597_v53 }
  0xdc   : > { %v656_v32 = vsub.f32 1.0, %v1636_v24  ;;  %v701_v11 = vmul.f32 %v502_v0, %v1338_v35  ;;  %v611_v36 = vsub.f32 1.0, %v610_v3  ;;  %vm1668_vm3 = vcmp.eq.f32.partialorder %v603_v34, 8.507059e+37 }
  0xdd   : > { %vm1680_vm5 = vcmp.eq.f32.partialorder %v558_v4, 8.507059e+37  ;;  %v508_v13 = vadd.f32 %v1075_v6, %v507_v2  ;;  %vm509_vm6 = vweird.f32 %v1581_v9  ;;  %v567_v35 = vmul.f32 %v1646_v44, %v566_v54 }
  0xde   : > { %v1686_v34 = vpop.eup %1080  ;;  %v557_v47 = vsel %vm1676_vm4, %v1533_v28, %v553_v49  ;;  %v561_v59 = vor.u32 1.1754944e-38, %v560_v5  ;;  %vm511_vm7 = vmor %vm509_vm6, %vm510_vm2  ;;  %vm514_vm8 = vcmp.eq.f32.partialorder %v513_v17, 8.507059e+37  ;;  %v516_v27 = vor.u32 1.1754944e-38, %v515_v8 }
  0xdf   : > { %v512_v53 = vsel %vm511_vm7, %v1075_v6, %v508_v13  ;;  %v568_v40 = vadd.f32 %v1646_v44, %v567_v35  ;;  %vm570_vm9 = vweird.f32 %v1646_v44  ;;  %v626_v24 = vsub.f32 1.0, %v625_v19 }
  0xe0   : > { %v1694_v9 = vpop.eup %1082  ;;  %v717_v25 = vadd.f32 %v716_v22, %v701_v11  ;;  %v612_v33 = vmul.f32 %v1619_v52, %v611_v36  ;;  %v517_v61 = vsel %vm514_vm8, %v516_v27, %v512_v53  ;;  %v575_v1 = vand.u32 2147483648, %v1583_v7 }
  0xe1   : > { %v670_v6 = vmul.f32 %v1686_v34, %v1617_v26  ;;  %v702_v4 = vmul.f32 %v517_v61, %v1429_v46  ;;  %vm569_vm11 = vweird.f32 %v1583_v7  ;;  %v573_v22 = vand.u32 2147483647, %v1583_v7 }
  0xe2   : > { %v602_v5 = vsel %vm1702_vm10, %v1527_v48, %v598_v30  ;;  %vm659_vm12 = vweird.f32 %v1505_v41  ;;  %vm660_vm13 = vweird.f32 %v1598_v38  ;;  %v562_v55 = vsel %vm1680_vm5, %v561_v59, %v557_v47  ;;  %vm1721_vm15 = vmor %vm569_vm11, %vm570_vm9 }
  0xe3   : > { %vm614_vm14 = vweird.f32 %v1545_v60  ;;  %v718_v7 = vadd.f32 %v717_v25, %v702_v4  ;;  %v572_v48 = vsel %vm1721_vm15, %v1646_v44, %v568_v40  ;;  %v627_v3 = vmul.f32 %v1654_v16, %v626_v24  ;;  %vm1777_vm9 = vmor %vm659_vm12, %vm660_vm13 }
  0xe4   : > { %v685_v0 = vmul.f32 %v1694_v9, %v1642_v58  ;;  %v613_v10 = vadd.f32 %v1619_v52, %v612_v33  ;;  %vm615_vm0 = vweird.f32 %v1619_v52  ;;  %v620_v15 = vand.u32 2147483648, %v1545_v60 }
  0xe5   : > { %v576_v49 = vor.u32 1.1754944e-38, %v575_v1  ;;  %v657_v17 = vmul.f32 %v1598_v38, %v656_v32  ;;  %v671_v8 = vsub.f32 1.0, %v670_v6  ;;  %v719_v2 = vadd.f32 %v718_v7, %v1548_v62  ;;  %vm1743_vm2 = vmor %vm614_vm14, %vm615_vm0 }
  0xe6   : > { %vm574_vm1 = vcmp.eq.f32.partialorder %v573_v22, 8.507059e+37  ;;  %v607_v44 = vsel %vm1668_vm3, %v1614_v23, %v602_v5  ;;  %v705_v54 = vmul.f32 %v562_v55, %v1356_v50  ;;  %v618_v19 = vand.u32 2147483647, %v1545_v60 }
  0xe7   : > { %v577_v30 = vsel %vm574_vm1, %v576_v49, %v572_v48  ;;  %v720_v32 = vadd.f32 %v719_v2, %v1623_v42  ;;  %v628_v62 = vadd.f32 %v1654_v16, %v627_v3  ;;  %vm630_vm4 = vweird.f32 %v1654_v16 }
  0xe8   : > { %v686_v36 = vsub.f32 1.0, %v685_v0  ;;  %v617_v50 = vsel %vm1743_vm2, %v1619_v52, %v613_v10  ;;  %v621_v23 = vor.u32 1.1754944e-38, %v620_v15  ;;  %vm629_vm3 = vweird.f32 %v1586_v18 }
  0xe9   : > { %v635_v60 = vand.u32 2147483648, %v1586_v18  ;;  %v672_v37 = vmul.f32 %v1686_v34, %v671_v8  ;;  %v706_v51 = vmul.f32 %v577_v30, %v1445_v56  ;;  %v721_v31 = vadd.f32 %v720_v32, %v705_v54  ;;  %vm1761_vm8 = vmor %vm629_vm3, %vm630_vm4 }
  0xea   : > { %v633_v42 = vand.u32 2147483647, %v1586_v18  ;;  %v658_v13 = vadd.f32 %v1598_v38, %v657_v17  ;;  %vm619_vm5 = vcmp.eq.f32.partialorder %v618_v19, 8.507059e+37  ;;  %vm674_vm6 = vweird.f32 %v1617_v26 }
  0xeb   : > { %vm675_vm7 = vweird.f32 %v1686_v34  ;;  %v622_v35 = vsel %vm619_vm5, %v621_v23, %v617_v50  ;;  %v722_v47 = vadd.f32 %v721_v31, %v706_v51  ;;  %v632_v56 = vsel %vm1761_vm8, %v1654_v16, %v628_v62 }
  0xec   : > { %v687_v59 = vmul.f32 %v1694_v9, %v686_v36  ;;  %v665_v18 = vand.u32 2147483648, %v1505_v41  ;;  %v678_v27 = vand.u32 2147483647, %v1617_v26  ;;  %v680_v53 = vand.u32 2147483648, %v1617_v26  ;;  %vm1797_vm12 = vmor %vm674_vm6, %vm675_vm7 }
  0xed   : > { %v636_v40 = vor.u32 1.1754944e-38, %v635_v60  ;;  %v708_v24 = vmul.f32 %v607_v44, %v1349_v45  ;;  %v673_v16 = vadd.f32 %v1686_v34, %v672_v37  ;;  %v723_v33 = vadd.f32 %v722_v47, %v1604_v43 }
  0xee   : > { %vm634_vm10 = vcmp.eq.f32.partialorder %v633_v42, 8.507059e+37  ;;  %v662_v61 = vsel %vm1777_vm9, %v1598_v38, %v658_v13  ;;  %vm1788_vm11 = vcmp.eq.f32.partialorder %v663_v57, 8.507059e+37  ;;  %v709_v1 = vmul.f32 %v622_v35, %v1397_v14 }
  0xef   : > { %v637_v43 = vsel %vm634_vm10, %v636_v40, %v632_v56  ;;  %v724_v6 = vadd.f32 %v723_v33, %v708_v24  ;;  %v688_v38 = vadd.f32 %v1694_v9, %v687_v59  ;;  %vm689_vm13 = vweird.f32 %v1642_v58 }
  0xf0   : > { %vm690_vm14 = vweird.f32 %v1694_v9  ;;  %v666_v41 = vor.u32 1.1754944e-38, %v665_v18  ;;  %vm679_vm15 = vcmp.eq.f32.partialorder %v678_v27, 8.507059e+37  ;;  %v681_v57 = vor.u32 1.1754944e-38, %v680_v53 }
  0xf1   : > { %v695_v14 = vand.u32 2147483648, %v1642_v58  ;;  %v677_v26 = vsel %vm1797_vm12, %v1686_v34, %v673_v16  ;;  %v710_v4 = vmul.f32 %v637_v43, %v1448_v39  ;;  %v725_v22 = vadd.f32 %v724_v6, %v709_v1  ;;  %vm691_vm0 = vmor %vm689_vm13, %vm690_vm14 }
  0xf2   : > { %v693_v5 = vand.u32 2147483647, %v1642_v58  ;;  %v667_v55 = vsel %vm1788_vm11, %v666_v41, %v662_v61  ;;  %v711_v46 = vmul.f32 %v1612_v20, %v1330_v29  ;;  %v692_v48 = vsel %vm691_vm0, %v1694_v9, %v688_v38  ;;  %v715_v9 = vld [vmem:[#allocation2] sm:$0x1] }
  0xf3   : > { %v726_v7 = vadd.f32 %v725_v22, %v710_v4  ;;  %v682_v3 = vsel %vm679_vm15, %v681_v57, %v677_v26  ;;  %v696_v0 = vor.u32 1.1754944e-38, %v695_v14  ;;  %v712_v10 = vmul.f32 %v667_v55, %v1376_v63 }
  0xf4   : > { %vm694_vm1 = vcmp.eq.f32.partialorder %v693_v5, 8.507059e+37  ;;  %v713_v15 = vmul.f32 %v682_v3, %v1465_v12 }
  0xf5   : > { %v727_v34 = vadd.f32 %v726_v7, %v711_v46  ;;  %v697_v39 = vsel %vm694_vm1, %v696_v0, %v692_v48 }
  0xf6   : > { %v714_v49 = vmul.f32 %v697_v39, %v1488_v21 }
  0xf7   : > { %v728_v58 = vadd.f32 %v727_v34, %v712_v10 }
  0xf9   : > { %v729_v17 = vadd.f32 %v728_v58, %v713_v15 }
  0xfb   : > { %v730_v8 = vadd.f32 %v729_v17, %v714_v49 }
  0xfd   : > { %v731_v2 = vrot.slane %v730_v8, 4 }
  0xff   : > { %v732_v44 = vadd.f32 %v731_v2, %v730_v8 }
 0x101   : > { %v733_v29 = vrot.slane %v732_v44, 2 }
 0x103   : > { %v734_v20 = vadd.f32 %v733_v29, %v732_v44 }
 0x105   : > { %v735_v54 = vrot.slane %v734_v20, 1 }
 0x107   : > { %v736_v19 = vadd.f32 %v735_v54, %v734_v20  ;;  %742 = sbr.rel (%p933_p1) target bundleno = 429 (0x1ad), region = 48 }
 0x109   : > { %v737_v30 = vadd.f32 %v736_v19, %v715_v9 }
 0x10b   : > { %738 = vst [vmem:[#allocation2] sm:$0x1] %v737_v30 }
 0x10c   : > { %v760_v63 = vld [vmem:[%s1919_s3 + $0x78] sm:$0xff]  ;;  %v759_v12 = vld [vmem:[%s1919_s3 + $0x70] sm:$0xff]  ;;  %v758_v21 = vld [vmem:[%s1919_s3 + $0x68] sm:$0xff] }
 0x10d   : > { %762 = vmatpush.msra.mxu0 %v760_v63  ;;  %v757_v11 = vld [vmem:[%s1919_s3 + $0x60] sm:$0xff]  ;;  %v756_v32 = vld [vmem:[%s1919_s3 + $0x58] sm:$0xff]  ;;  %v755_v62 = vld [vmem:[%s1919_s3 + $0x50] sm:$0xff] }
 0x10e   : > { %v754_v36 = vld [vmem:[%s1919_s3 + $0x48] sm:$0xff]  ;;  %v753_v50 = vld [vmem:[%s1919_s3 + $0x40] sm:$0xff]  ;;  %v752_v23 = vld [vmem:[%s1919_s3 + $0x38] sm:$0xff] }
 0x10f   : > { %763 = vmatpush.msra.mxu0 %v759_v12  ;;  %v751_v60 = vld [vmem:[%s1919_s3 + $0x30] sm:$0xff]  ;;  %v750_v37 = vld [vmem:[%s1919_s3 + $0x28] sm:$0xff]  ;;  %v749_v51 = vld [vmem:[%s1919_s3 + $0x20] sm:$0xff] }
 0x110   : > { %v748_v31 = vld [vmem:[%s1919_s3 + $0x18] sm:$0xff]  ;;  %v747_v42 = vld [vmem:[%s1919_s3 + $0x10] sm:$0xff]  ;;  %v746_v52 = vld [vmem:[%s1919_s3 + $0x8] sm:$0xff] }
 0x111   : > { %764 = vmatpush.msra.mxu0 %v758_v21  ;;  %v745_v35 = vld [vmem:[%s1919_s3] sm:$0xff] }
 0x112   : > { %v743_v13 = vld [vmem:[#allocation2] sm:$0x1] }
 0x113   : > { %765 = vmatpush.msra.mxu0 %v757_v11  ;;  %v744_v47 = vmul.f32 0.00390625, %v743_v13  ;;  %v761_v56 = vld [vmem:[%s1920_s4] sm:$0x1] }
 0x115   : > { %766 = vmatpush.msra.mxu0 %v756_v32 }
 0x117   : > { %767 = vmatpush.msra.mxu0 %v755_v62 }
 0x119   : > { %768 = vmatpush.msra.mxu0 %v754_v36 }
 0x11b   : > { %769 = vmatpush.msra.mxu0 %v753_v50 }
 0x11d   : > { %770 = vmatpush.msra.mxu0 %v752_v23 }
 0x11f   : > { %771 = vmatpush.msra.mxu0 %v751_v60 }
 0x121   : > { %772 = vmatpush.msra.mxu0 %v750_v37 }
 0x123   : > { %773 = vmatpush.msra.mxu0 %v749_v51 }
 0x125   : > { %774 = vmatpush.msra.mxu0 %v748_v31 }
 0x127   : > { %775 = vmatpush.msra.mxu0 %v747_v42 }
 0x129   : > { %776 = vmatpush.msra.mxu0 %v746_v52 }
 0x12b   : > { %777 = vmatpush.msra.mxu0 %v745_v35 }
 0x12c   : > { %778 = vmatmul.f32.vlgmr.msra.gmra.mxu0 %v744_v47 }
 0x1a9   : > { %v779_v59 = vpop.f32.mrf.mxu0 }
 0x1aa   : > { %v780_v18 = vadd.f32 %v779_v59, %v761_v56 }
 0x1ac   : > { %782 = vst [vmem:[%s1289_s27] sm:$0x1] %v780_v18 }
 0x1ad PF: > { %s792_s16 = scalar_lea.hbm %s1921_s5, %s1166_s22  ;;  %s794_s17 = sshll.u32 %s1289_s27, 4  ;;  %s795_s17 = int_to_ptr.vmem [resolvable:$true] %s794_s17 }
 0x1ae   : > { %s796_s26 = sshll.u32 %s792_s16, 4  ;;  %s784_s7 = scalar_lea.sflag [#allocation4], %s238_s10  ;;  %s797_s26 = int_to_ptr.hbm [resolvable:$true] %s796_s26 }
 0x1af   : > { %s1098_s8 = sshra.s32 %s797_s26, 4  ;;  %s1104_s13 = scalar_lea.hbm %s1921_s5, 2  ;;  %s1099_s8 = int_to_ptr.hbm [resolvable:$true] %s1098_s8 }
 0x1b0   : > { %s1100_s21 = scalar_lea.hbm %s1099_s8, 1  ;;  %p1105_p6 = scmp.lt.s32.totalorder %s1099_s8, %s1921_s5 }
 0x1b1   : > { %p1101_p2 = scmp.ne.s32.totalorder %s1099_s8, %s1100_s21  ;;  %p1106_p7 = scmp.lt.s32.totalorder %s1104_s13, %s1100_s21 }
 0x1b3   : > { %p1102_p4 = pnand %p1101_p2, %p1260_p3  ;;  %p1107_p8 = por %p1106_p7, %p1105_p6 }
 0x1b5   : > { %p1103_p5 = pneg %p1102_p4 }
 0x1b7   : > { %p1108_p10 = pnand %p1107_p8, %p1103_p5 }
 0x1b9   : > { %1111 = shalt.err (!%p1108_p10)
}
 0x1ba   : > { %947 = dma.vmem_to_hbm [thread:$0]  (%p1260_p3), %s795_s17, 16, %s797_s26, %s784_s7  }
 0x1bb PF: > { %p953_p11 = scmp.ge.s32.totalorder %s1178_s25, 2  ;;  %s808_s22 = sand.u32 1, %s1150_s18  }
 0x1bc   : > { %s809_s10 = scalar_lea.sflag [#allocation4], %s808_s22 }
 0x1bd   : > { %p950_p12 = pnand %p953_p11, %p1270_p9 }
 0x1bf   : > { %p951_p13 = pneg %p950_p12 }
 0x1c1   : > { %1145 = dma.done.wait (%p951_p13), %s809_s10, 16  }
 0x1c2   : > { %1147 = vsyncadd (%p951_p13), %s809_s10, 4294967280  ;;  %s18_s25 = sadd.s32 1, %s1178_s25   ;;  %s1968_s18 = smov %s1154_s19 }
 0x1c3   : > { %p15_p0 = scmp.ge.s32.totalorder %s18_s25, 6   ;;  %s1969_s19 = smov %s1158_s20 }
 0x1c4   : > { %s1970_s20 = smov %s1278_s9  ;;  %s1971_s21 = smov %s1170_s23 }
 0x1c5   : > { %s1972_s22 = smov %s1174_s24  ;;  %s1973_s23 = smov %s1976_s28 }
 0x1c6   : > { %s1974_s24 = smov %s1980_s29  ;;  %17 = sbr.rel (!%p15_p0) target bundleno = 5 (0x5), region = 83 }
 0x1cb   :  { %814 = vsyncpa [#allocation4], 1 }
 0x1cc   :  { %816 = vsyncpa [#allocation4 + $0x1], 1 }

</bundles_post_ra>
